<compile_context>
chip_gen: v6e
topology: v6e:2x2x1
jax: 0.10.0
libtpu: 0.0.40
codegen_flags: <defaults>
</compile_context>

<pallas_src>
import jax
import jax.numpy as jnp
from jax.experimental import pallas as pl
from jax.experimental.pallas import tpu as pltpu


def _koopman_mse_kernel(yt_ref, xt_ref, w1t_ref, b1_ref, w2t_ref, b2_ref,
                        w3t_ref, b3_ref, out_ref):
    # All arrays are time-on-lanes:
    #   yt_ref: [F2, tile_t]   xt_ref: [D, tile_t]
    #   w1t: [N, F2]  b1: [N, 1]   w2t: [H2, N]  b2: [H2, 1]
    #   w3t: [D, H2]  b3: [D, 1]   out_ref: [1, tile_t]
    yt = yt_ref[...]                                              # f32 already

    h1 = jnp.dot(w1t_ref[...], yt,
                 preferred_element_type=jnp.float32) + b1_ref[...]   # [N, tile_t]
    h1 = jnp.tanh(h1)

    h2 = jnp.dot(w2t_ref[...], h1,
                 preferred_element_type=jnp.float32) + b2_ref[...]   # [H2, tile_t]
    h2 = jnp.tanh(h2)

    xhat = jnp.dot(w3t_ref[...], h2,
                   preferred_element_type=jnp.float32) + b3_ref[...]  # [D, tile_t]

    diff = xhat - xt_ref[...]
    # mean over the feature (sublane) axis -> lane-dense per-time-step error row
    out_ref[...] = jnp.mean(diff * diff, axis=0, keepdims=True)       # [1, tile_t]


def koopman_forward(y, x, params, *, tile_t=512):
    """forward(y, x) = mean((decode(y) - x)**2, axis=-1) via a Pallas kernel.

    y: [T, 2*num_freq] f32, x: [T, x_dim] f32, params in [in, out] layout.
    Returns per-time-step error of shape [T].
    """
    w1, b1, w2, b2, w3, b3 = params
    T, F2 = y.shape
    _, D = x.shape
    N = w1.shape[1]
    H2 = w2.shape[1]

    num_tiles = pl.cdiv(T, tile_t)
    T_pad = num_tiles * tile_t

    # Time-on-lanes layout; zero-pad T up to a tile multiple (padded columns
    # compute garbage errors that are sliced off below).
    yt = y.T                                  # [F2, T]
    xt = x.T                                  # [D, T]
    if T_pad != T:
        yt = jnp.pad(yt, ((0, 0), (0, T_pad - T)))
        xt = jnp.pad(xt, ((0, 0), (0, T_pad - T)))

    w1t, w2t, w3t = w1.T, w2.T, w3.T          # [N,F2], [H2,N], [D,H2]
    b1t, b2t, b3t = b1.T, b2.T, b3.T          # [N,1],  [H2,1], [D,1]

    cost = pl.CostEstimate(
        flops=2 * T_pad * (F2 * N + N * H2 + H2 * D) + 3 * T_pad * D,
        transcendentals=T_pad * (N + H2),
        bytes_accessed=4 * (T_pad * (F2 + D + 1)
                            + F2 * N + N * H2 + H2 * D + N + H2 + D),
    )

    out = pl.pallas_call(
        _koopman_mse_kernel,
        out_shape=jax.ShapeDtypeStruct((1, T_pad), jnp.float32),
        grid_spec=pltpu.PrefetchScalarGridSpec(
            num_scalar_prefetch=0,
            grid=(num_tiles,),
            in_specs=[
                pl.BlockSpec((F2, tile_t), lambda i: (0, i)),   # y^T tile
                pl.BlockSpec((D, tile_t), lambda i: (0, i)),    # x^T tile
                pl.BlockSpec((N, F2), lambda i: (0, 0)),        # W1^T (resident)
                pl.BlockSpec((N, 1), lambda i: (0, 0)),         # b1
                pl.BlockSpec((H2, N), lambda i: (0, 0)),        # W2^T
                pl.BlockSpec((H2, 1), lambda i: (0, 0)),        # b2
                pl.BlockSpec((D, H2), lambda i: (0, 0)),        # W3^T
                pl.BlockSpec((D, 1), lambda i: (0, 0)),         # b3
            ],
            out_specs=pl.BlockSpec((1, tile_t), lambda i: (0, i)),
        ),
        compiler_params=pltpu.CompilerParams(
            dimension_semantics=("parallel",)),
        cost_estimate=cost,
    )(yt, xt, w1t, b1t, w2t, b2t, w3t, b3t)

    return out[0, :T]


def koopman_forward_ref(y, x, params):
    """Pure-JAX reference for validation."""
    w1, b1, w2, b2, w3, b3 = params
    h1 = jnp.tanh(y @ w1 + b1)
    h2 = jnp.tanh(h1 @ w2 + b2)
    xhat = h2 @ w3 + b3
    return jnp.mean((xhat - x) ** 2, axis=-1)


def init_params(key, num_freq, n, x_dim):
    """Deterministic synthetic parameters (shapes from fully_connected_mse)."""
    k1, k2, k3 = jax.random.split(key, 3)
    f2 = 2 * num_freq
    w1 = jax.random.normal(k1, (f2, n), jnp.float32) * (1.0 / jnp.sqrt(f2))
    b1 = jnp.zeros((1, n), jnp.float32)
    w2 = jax.random.normal(k2, (n, 32), jnp.float32) * (1.0 / jnp.sqrt(n))
    b2 = jnp.zeros((1, 32), jnp.float32)
    w3 = jax.random.normal(k3, (32, x_dim), jnp.float32) * (1.0 / jnp.sqrt(32.0))
    b3 = jnp.zeros((1, x_dim), jnp.float32)
    return (w1, b1, w2, b2, w3, b3)


if __name__ == "__main__":
    # T=1000 time snapshots (deliberately NOT a tile multiple, to exercise the
    # padded tail), num_freq=4 (-> 2*num_freq=8 features), hidden n=32,
    # data dimension x_dim=16.  tile_t=256 -> 4 parallel grid steps (uses both
    # TensorCores on v7x) and validates the multi-step grid/index_map path.
    T, num_freq, n, x_dim = 1000, 4, 32, 16

    key = jax.random.PRNGKey(0)
    k_y, k_x, k_p = jax.random.split(key, 3)

    y = jax.random.normal(k_y, (T, 2 * num_freq), jnp.float32)
    x = jax.random.normal(k_x, (T, x_dim), jnp.float32)
    params = init_params(k_p, num_freq, n, x_dim)

    err = koopman_forward(y, x, params, tile_t=256)
    err = jax.block_until_ready(err)

    err_ref = koopman_forward_ref(y, x, params)
    assert err.shape == (T,)
    assert jnp.allclose(err, err_ref, atol=1e-5, rtol=1e-4), (err, err_ref)

    print("KERNEL_OK")
</pallas_src>

<mosaic_0001>
module attributes {stable_mosaic.version = 11 : i64} {
  func.func @_koopman_mse_kernel(%arg0: i32, %arg1: memref<8x256xf32, #tpu.memory_space<vmem>>, %arg2: memref<16x256xf32, #tpu.memory_space<vmem>>, %arg3: memref<32x8xf32, #tpu.memory_space<vmem>>, %arg4: memref<32x1xf32, #tpu.memory_space<vmem>>, %arg5: memref<32x32xf32, #tpu.memory_space<vmem>>, %arg6: memref<32x1xf32, #tpu.memory_space<vmem>>, %arg7: memref<16x32xf32, #tpu.memory_space<vmem>>, %arg8: memref<16x1xf32, #tpu.memory_space<vmem>>, %arg9: memref<1x256xf32, #tpu.memory_space<vmem>>) attributes {dimension_semantics = [#tpu.dimension_semantics<parallel>], iteration_bounds = array<i64: 4>, scalar_prefetch = 0 : i64, scratch_operands = 0 : i64, tpu.core_type = #tpu.core_type<tc>, window_params = [{transform_indices = @transform_0, window_bounds = array<i64: 8, 256>}, {transform_indices = @transform_1, window_bounds = array<i64: 16, 256>}, {pipeline_mode = #tpu.pipeline_mode<synchronous>, transform_indices = @transform_2, window_bounds = array<i64: 32, 8>}, {pipeline_mode = #tpu.pipeline_mode<synchronous>, transform_indices = @transform_3, window_bounds = array<i64: 32, 1>}, {pipeline_mode = #tpu.pipeline_mode<synchronous>, transform_indices = @transform_4, window_bounds = array<i64: 32, 32>}, {pipeline_mode = #tpu.pipeline_mode<synchronous>, transform_indices = @transform_5, window_bounds = array<i64: 32, 1>}, {pipeline_mode = #tpu.pipeline_mode<synchronous>, transform_indices = @transform_6, window_bounds = array<i64: 16, 32>}, {pipeline_mode = #tpu.pipeline_mode<synchronous>, transform_indices = @transform_7, window_bounds = array<i64: 16, 1>}, {transform_indices = @transform_8, window_bounds = array<i64: 1, 256>}]} {
    %c0 = arith.constant 0 : index
    %c0_0 = arith.constant 0 : index
    %0 = vector.load %arg1[%c0, %c0_0] : memref<8x256xf32, #tpu.memory_space<vmem>>, vector<8x256xf32>
    %c0_1 = arith.constant 0 : index
    %c0_2 = arith.constant 0 : index
    %1 = vector.load %arg3[%c0_1, %c0_2] : memref<32x8xf32, #tpu.memory_space<vmem>>, vector<32x8xf32>
    %cst = arith.constant dense<0.000000e+00> : vector<32x256xf32>
    %2 = tpu.matmul %1, %0, %cst {dimension_numbers = #tpu.dot_dimension_numbers<[1], [0], [0], [1], [0, 0, 1, 1], [], []>} : vector<32x8xf32>, vector<8x256xf32>, vector<32x256xf32> -> vector<32x256xf32>
    %c0_3 = arith.constant 0 : index
    %c0_4 = arith.constant 0 : index
    %3 = vector.load %arg4[%c0_3, %c0_4] : memref<32x1xf32, #tpu.memory_space<vmem>>, vector<32x1xf32>
    %4 = vector.broadcast %3 : vector<32x1xf32> to vector<32x256xf32>
    %5 = arith.addf %2, %4 : vector<32x256xf32>
    %6 = math.tanh %5 : vector<32x256xf32>
    %c0_5 = arith.constant 0 : index
    %c0_6 = arith.constant 0 : index
    %7 = vector.load %arg5[%c0_5, %c0_6] : memref<32x32xf32, #tpu.memory_space<vmem>>, vector<32x32xf32>
    %cst_7 = arith.constant dense<0.000000e+00> : vector<32x256xf32>
    %8 = tpu.matmul %7, %6, %cst_7 {dimension_numbers = #tpu.dot_dimension_numbers<[1], [0], [0], [1], [0, 0, 1, 1], [], []>} : vector<32x32xf32>, vector<32x256xf32>, vector<32x256xf32> -> vector<32x256xf32>
    %c0_8 = arith.constant 0 : index
    %c0_9 = arith.constant 0 : index
    %9 = vector.load %arg6[%c0_8, %c0_9] : memref<32x1xf32, #tpu.memory_space<vmem>>, vector<32x1xf32>
    %10 = vector.broadcast %9 : vector<32x1xf32> to vector<32x256xf32>
    %11 = arith.addf %8, %10 : vector<32x256xf32>
    %12 = math.tanh %11 : vector<32x256xf32>
    %c0_10 = arith.constant 0 : index
    %c0_11 = arith.constant 0 : index
    %13 = vector.load %arg7[%c0_10, %c0_11] : memref<16x32xf32, #tpu.memory_space<vmem>>, vector<16x32xf32>
    %cst_12 = arith.constant dense<0.000000e+00> : vector<16x256xf32>
    %14 = tpu.matmul %13, %12, %cst_12 {dimension_numbers = #tpu.dot_dimension_numbers<[1], [0], [0], [1], [0, 0, 1, 1], [], []>} : vector<16x32xf32>, vector<32x256xf32>, vector<16x256xf32> -> vector<16x256xf32>
    %c0_13 = arith.constant 0 : index
    %c0_14 = arith.constant 0 : index
    %15 = vector.load %arg8[%c0_13, %c0_14] : memref<16x1xf32, #tpu.memory_space<vmem>>, vector<16x1xf32>
    %16 = vector.broadcast %15 : vector<16x1xf32> to vector<16x256xf32>
    %17 = arith.addf %14, %16 : vector<16x256xf32>
    %c0_15 = arith.constant 0 : index
    %c0_16 = arith.constant 0 : index
    %18 = vector.load %arg2[%c0_15, %c0_16] : memref<16x256xf32, #tpu.memory_space<vmem>>, vector<16x256xf32>
    %19 = arith.subf %17, %18 : vector<16x256xf32>
    %20 = arith.mulf %19, %19 : vector<16x256xf32>
    %cst_17 = arith.constant dense<0.000000e+00> : vector<256xf32>
    %21 = vector.multi_reduction <add>, %20, %cst_17 [0] : vector<16x256xf32> to vector<256xf32>
    %22 = vector.shape_cast %21 : vector<256xf32> to vector<1x256xf32>
    %cst_18 = arith.constant 1.600000e+01 : f32
    %23 = vector.broadcast %cst_18 : f32 to vector<1x256xf32>
    %24 = arith.divf %22, %23 : vector<1x256xf32>
    %c0_19 = arith.constant 0 : index
    %c0_20 = arith.constant 0 : index
    %25 = vector.load %arg9[%c0_19, %c0_20] : memref<1x256xf32, #tpu.memory_space<vmem>>, vector<1x256xf32>
    tpu.vector_store %arg9[%c0_19, %c0_20], %24 {strides = array<i32>} : memref<1x256xf32, #tpu.memory_space<vmem>>, vector<1x256xf32>,
    return
  }
  func.func @transform_0(%arg0: i32) -> (i32, i32) {
    %c0_i32 = arith.constant 0 : i32
    %c0_i32_0 = arith.constant 0 : i32
    return %c0_i32, %arg0 : i32, i32
  }
  func.func @transform_1(%arg0: i32) -> (i32, i32) {
    %c0_i32 = arith.constant 0 : i32
    %c0_i32_0 = arith.constant 0 : i32
    return %c0_i32, %arg0 : i32, i32
  }
  func.func @transform_2(%arg0: i32) -> (i32, i32) {
    %c0_i32 = arith.constant 0 : i32
    %c0_i32_0 = arith.constant 0 : i32
    %c0_i32_1 = arith.constant 0 : i32
    return %c0_i32, %c0_i32_0 : i32, i32
  }
  func.func @transform_3(%arg0: i32) -> (i32, i32) {
    %c0_i32 = arith.constant 0 : i32
    %c0_i32_0 = arith.constant 0 : i32
    %c0_i32_1 = arith.constant 0 : i32
    return %c0_i32, %c0_i32_0 : i32, i32
  }
  func.func @transform_4(%arg0: i32) -> (i32, i32) {
    %c0_i32 = arith.constant 0 : i32
    %c0_i32_0 = arith.constant 0 : i32
    %c0_i32_1 = arith.constant 0 : i32
    return %c0_i32, %c0_i32_0 : i32, i32
  }
  func.func @transform_5(%arg0: i32) -> (i32, i32) {
    %c0_i32 = arith.constant 0 : i32
    %c0_i32_0 = arith.constant 0 : i32
    %c0_i32_1 = arith.constant 0 : i32
    return %c0_i32, %c0_i32_0 : i32, i32
  }
  func.func @transform_6(%arg0: i32) -> (i32, i32) {
    %c0_i32 = arith.constant 0 : i32
    %c0_i32_0 = arith.constant 0 : i32
    %c0_i32_1 = arith.constant 0 : i32
    return %c0_i32, %c0_i32_0 : i32, i32
  }
  func.func @transform_7(%arg0: i32) -> (i32, i32) {
    %c0_i32 = arith.constant 0 : i32
    %c0_i32_0 = arith.constant 0 : i32
    %c0_i32_1 = arith.constant 0 : i32
    return %c0_i32, %c0_i32_0 : i32, i32
  }
  func.func @transform_8(%arg0: i32) -> (i32, i32) {
    %c0_i32 = arith.constant 0 : i32
    %c0_i32_0 = arith.constant 0 : i32
    return %c0_i32, %arg0 : i32, i32
  }
}

</mosaic_0001>

<bundles_post_ra>
// kernel: tpu_custom_call.1
= control target key start
LH: loop header
LB: loop body
LE: loop exit
PB: predicated region body
PF: predicated region fallthrough
CT: control target
= control target key end

     0   :  { %13 = vsyncpa [#allocation3], 0  ;;  %s1364_s0 = inlined_call_operand.vmem [shape: f32[8,1024], index: 0, kind: input, shape index: {}]   ;;  %s1365_s1 = inlined_call_operand.hbm [shape: f32[16,1024], index: 1, kind: input, shape index: {}]   ;;  %s1366_s2 = inlined_call_operand.vmem [shape: f32[32,8], index: 2, kind: input, shape index: {}]   ;;  %s1367_s3 = inlined_call_operand.vmem [shape: f32[32,1], index: 3, kind: input, shape index: {}]   ;;  %s1368_s4 = inlined_call_operand.vmem [shape: f32[32,32], index: 4, kind: input, shape index: {}]   ;;  %s1369_s5 = inlined_call_operand.vmem [shape: f32[32,1], index: 5, kind: input, shape index: {}]   ;;  %s1370_s6 = inlined_call_operand.vmem [shape: f32[16,32], index: 6, kind: input, shape index: {}]   ;;  %s1371_s7 = inlined_call_operand.vmem [shape: f32[16,1], index: 7, kind: input, shape index: {}]   ;;  %s1372_s8 = inlined_call_operand.hbm [shape: f32[1,1024], index: 8, kind: output, shape index: {}]  }
   0x1   :  { %15 = vsyncpa [#allocation3 + $0x1], 0 }
   0x2   :  { %16 = vsyncpa [#allocation4], 0 }
   0x3   :  { %18 = vsyncpa [#allocation4 + $0x1], 0  ;;  %s1133_s27 = smov 0   ;;  %s1135_s28 = smov 0  }
   0x4   :  { %s1137_s29 = smov 0   ;;  %s1139_s30 = smov 0  }
   0x5 LB: > { %s1154_s9 = sadd.s32 4294967295, %s1078_s30   ;;  %s872_s10 = sadd.s32 4294967294, %s1078_s30   ;;  %s1078_s30 = sphi %s1139_s30, %s1389_s30   ;;  %s1074_s29 = sphi %s1137_s29, %s1388_s29   ;;  %s1070_s28 = sphi %s1135_s28, %s1387_s28   ;;  %s1066_s27 = sphi %s1133_s27, %s1386_s27  }
   0x6   : > { %s1158_s11 = sadd.s32 1, %s1078_s30   ;;  %s57_s12 = sadd.s32 1, %s1074_s29 }
   0x7   : > { %s54_s13 = ssub.s32 %s1078_s30, %s1158_s11  ;;  %p64_p0 = scmp.ne.s32.totalorder %s1074_s29, %s1070_s28 }
   0x8   : > { %p55_p1 = scmp.eq.s32.totalorder %s54_s13, 0  ;;  %p65_p2 = scmp.eq.s32.totalorder %s1078_s30, 0 }
   0x9   : > { %p70_p3 = scmp.ne.s32.totalorder %s1070_s28, %s1066_s27  ;;  %p71_p4 = scmp.eq.s32.totalorder %s1154_s9, 0 }
   0xa   : > { %s1170_s14 = scalar_select %p55_p1, %s1074_s29, %s57_s12  }
   0xb   : > { %p1172_p5 = por %p65_p2, %p64_p0  ;;  %p1176_p6 = por %p71_p4, %p70_p3 }
   0xc   : > { %1375 = sst [smem:[#allocation8_spill]] %s1170_s14  ;;  %p220_p7 = scmp.eq.s32.totalorder %s1154_s9, 3 }
   0xd   : > { %s1377_s16 = scalar_select %p1176_p6, 1, 0 }
   0xe   : > { %p226_p8 = scmp.eq.s32.totalorder %s872_s10, 3  ;;  %p912_p9 = scmp.lt.s32.totalorder %s1078_s30, 4 }
   0xf   : > { %p1182_p10 = por %p220_p7, %p64_p0  ;;  %s273_s19 = sand.u32 1, %s1074_s29  }
  0x10   : > { %p1186_p11 = por %p226_p8, %p70_p3  ;;  %s898_s20 = sshll.u32 %s1078_s30, 8 }
  0x11   : > { %s1378_s17 = scalar_select %p1182_p10, 1, 0 }
  0x12   : > { %s1379_s18 = scalar_select %p1186_p11, 1, 0 }
  0x13   : > { %s875_s21 = sshll.u32 %s273_s19, 5  ;;  %s1195_s24 = scalar_lea.hbm %s1365_s1, %s898_s20 }
  0x14   : > { %s277_s25 = scalar_lea.vmem [#allocation2], %s875_s21  ;;  %p1199_p12 = pnand %p912_p9, %p1172_p5 }
  0x15   : > { %s284_s26 = sshll.u32 %s277_s25, 4  ;;  %s1206_s12 = scalar_lea.sflag [#allocation3], %s273_s19  ;;  %s1203_s26 = int_to_ptr.vmem [resolvable:$true] %s284_s26 }
  0x16   : > { %s986_s13 = scalar_lea.hbm %s1195_s24, 512  ;;  %p988_p1 = pneg %p1199_p12 }
  0x17   : > { %p987_p0 = scmp.ne.s32.totalorder %s1195_s24, %s986_s13  ;;  %s991_s15 = scalar_lea.hbm %s1365_s1, 2048 }
  0x18   : > { %p992_p4 = scmp.lt.s32.totalorder %s1195_s24, %s1365_s1  ;;  %p993_p5 = scmp.lt.s32.totalorder %s991_s15, %s986_s13 }
  0x19   : > { %p989_p2 = pnand %p988_p1, %p987_p0 }
  0x1a   : > { %p994_p7 = por %p993_p5, %p992_p4 }
  0x1b   : > { %p990_p3 = pneg %p989_p2 }
  0x1d   : > { %p995_p8 = pnand %p994_p7, %p990_p3 }
  0x1f   : > { %998 = shalt.err (!%p995_p8)
}
  0x20   : > { %s999_s19 = scalar_lea.vmem %s1203_s26, 512  ;;  %s1080_s25 = smov [#allocation2]  }
  0x21   : > { %p1000_p9 = scmp.ne.s32.totalorder %s1203_s26, %s999_s19  ;;  %s1004_s14 = sshll.u32 %s1080_s25, 4  ;;  %s1005_s14 = int_to_ptr.vmem [resolvable:$false] %s1004_s14 }
  0x22   : > { %s1006_s20 = scalar_lea.vmem %s1005_s14, 1024  ;;  %p1007_p2 = scmp.lt.s32.totalorder %s1203_s26, %s1005_s14 }
  0x23   : > { %p1002_p13 = pnand %p1000_p9, %p988_p1  ;;  %p1008_p11 = scmp.lt.s32.totalorder %s1006_s20, %s999_s19 }
  0x25   : > { %p1003_p0 = pneg %p1002_p13  ;;  %p1009_p10 = por %p1008_p11, %p1007_p2 }
  0x27   : > { %p1010_p6 = pnand %p1009_p10, %p1003_p0 }
  0x29   : > { %1013 = shalt.err (!%p1010_p6)
}
  0x2a   : > { %s1081_s13 = smov 1024   ;;  %s1082_s21 = smov 256  }
  0x2b   : > { %s1083_s15 = smov 16   ;;  %p292_p13 = scmp.lt.s32.totalorder %s1078_s30, 5 }
  0x2c   : > { %907 = dma.hbm_to_vmem [thread:$0]  (!%p1199_p12), %s1195_s24, 512, %s1203_s26, %s1206_s12, %s1081_s13, %s1082_s21, %s1083_s15  }
  0x2d   : > { %p1381_p1 = scmp.ge.s32.totalorder %s1078_s30, 1 }
  0x2f   : > { %p293_p3 = pnand %p1381_p1, %p292_p13 }
  0x30   : > { %s1231_s14 = sand.u32 (!%p293_p3), 1, %s1070_s28   ;;  %p1382_p6 = scmp.ne.s32.totalorder (!%p293_p3), %s1377_s16, 0 }
  0x31   : > { %296 = sbr.rel (%p293_p3) target bundleno = 766 (0x2fe), region = 52  ;;  %s879_s22 = sshll.u32 (!%p293_p3), %s1231_s14, 5 }
  0x32   : > { %s299_s23 = scalar_lea.sflag (!%p293_p3), [#allocation3], %s1231_s14  ;;  %s1235_s19 = scalar_lea.vmem (!%p293_p3), [#allocation2], %s879_s22 }
  0x36   : > { %1057 = dma.done.wait (%p1382_p6), %s299_s23, 512  }
  0x37   : > { %1059 = vsyncadd (%p1382_p6), %s299_s23, 4294966784  ;;  %s881_s24 = sshll.u32 %s1154_s9, 1  ;;  %v1084_v0 = vmov 0.0   ;;  %v1085_v1 = vmov 0   ;;  %v350_v4 = vld [vmem:[%s1366_s2] sm:$0xff]  ;;  %vm378_vm0 = vcmask 64512  }
  0x38   : > { %p341_p10 = scmp.lt.s32.totalorder %s881_s24, 7  ;;  %455 = vmatprep.mubr.f32.mxu0 %v1084_v0  ;;  %953 = vset.pattern.permute.xlu1 %v1085_v1  ;;  %v357_v5 = vld [vmem:[%s1367_s3 + $0x18] sm:$0xff]  ;;  %v355_v6 = vld [vmem:[%s1367_s3 + $0x8] sm:$0xff]  ;;  %v356_v8 = vld [vmem:[%s1367_s3 + $0x10] sm:$0xff]  ;;  %vm516_vm1 = vcmask 261120   ;;  %s899_s15 = sshll.u32 %s1154_s9, 5 }
  0x39   : > { %952 = vset.pattern.permute.xlu0 %v1085_v1  ;;  %593 = vmatprep.mubr.f32.mxu1 %v1084_v0  ;;  %v351_v7 = vld [vmem:[%s1366_s2 + $0x8] sm:$0xff]  ;;  %v354_v9 = vld [vmem:[%s1367_s3] sm:$0xff]  ;;  %v352_v10 = vld [vmem:[%s1366_s2 + $0x10] sm:$0xff]  ;;  %s788_s10 = scalar_lea.hbm %s1372_s8, %s899_s15  ;;  %s776_s12 = scalar_lea.sflag [#allocation4], %s1231_s14 }
  0x3a   : > { %s1391_s24 = smov (!%p341_p10, %s881_s24), 7  ;;  %375 = vperm.xlu0 %952, %v357_v5   ;;  %365 = vperm.xlu1 %953, %v355_v6   ;;  %v495_v11 = vld [vmem:[%s1369_s5 + $0x18] sm:$0xff]  ;;  %v494_v12 = vld [vmem:[%s1369_s5 + $0x10] sm:$0xff]  ;;  %v493_v14 = vld [vmem:[%s1369_s5 + $0x8] sm:$0xff]  ;;  %p1383_p12 = scmp.ne.s32.totalorder %s1378_s17, 0 }
  0x3b   : > { %s882_s26 = sshll.u32 %s1391_s24, 3  ;;  %v353_v13 = vld [vmem:[%s1366_s2 + $0x18] sm:$0xff]  ;;  %v492_v15 = vld [vmem:[%s1369_s5] sm:$0xff]  ;;  %v629_v17 = vld [vmem:[%s1371_s7 + $0x8] sm:$0xff]  ;;  %s1087_s16 = smov [#allocation5]  }
  0x3c   : > { %s344_s25 = scalar_lea.vmem %s1364_s0, %s882_s26  ;;  %v628_v16 = vld [vmem:[%s1371_s7] sm:$0xff]  ;;  %v489_v47 = vld [vmem:[%s1368_s4 + $0x8] sm:$0xff]  ;;  %v490_v48 = vld [vmem:[%s1368_s4 + $0x10] sm:$0xff]  ;;  %s1018_s20 = sshll.u32 %s1087_s16, 4  ;;  %s1019_s20 = int_to_ptr.vmem [resolvable:$false] %s1018_s20 }
  0x3d   : > { %v349_v2 = vld [vmem:[%s344_s25 + $0x8] sm:$0xff]  ;;  %v348_v3 = vld [vmem:[%s344_s25] sm:$0xff]  ;;  %v491_v49 = vld [vmem:[%s1368_s4 + $0x18] sm:$0xff]  ;;  %s1020_s9 = scalar_lea.vmem %s1019_s20, 64 }
  0x3e   : > { %421 = vmatprep.subr.mxu0 %v349_v2  ;;  %370 = vperm.xlu0 %952, %v356_v8   ;;  %v488_v45 = vld [vmem:[%s1368_s4] sm:$0xff] }
  0x3f   : > { %422 = vmatpush1.msra.mxu0 %v348_v3  ;;  %360 = vperm.xlu1 %953, %v354_v9  }
  0x40   : > { %883 = vmatmul.mubr.msk.f32.vlgmr.msra.gmra.mxu0 %vm378_vm0, %v350_v4 }
  0x41   : > { %461 = vmatprep.mubr.f32.mxu0 %v1084_v0 }
  0x42   : > { %513 = vperm.xlu0 %952, %v495_v11  }
  0x43   : > { %508 = vperm.xlu1 %953, %v494_v12  }
  0x44   : > { %884 = vmatmul.mubr.msk.f32.gmra.mxu0 %vm378_vm0, %v351_v7 }
  0x45   : > { %467 = vmatprep.mubr.f32.mxu0 %v1084_v0 }
  0x46   : > { %503 = vperm.xlu0 %952, %v493_v14   ;;  %v626_v14 = vld [vmem:[%s1370_s6] sm:$0xff] }
  0x47   : > { %498 = vperm.xlu1 %953, %v492_v15  }
  0x48   : > { %885 = vmatmul.mubr.msk.f32.gmra.mxu0 %vm378_vm0, %v352_v10 }
  0x49   : > { %473 = vmatprep.mubr.f32.mxu0 %v1084_v0 }
  0x4a   : > { %632 = vperm.xlu0 %952, %v628_v16   ;;  %v627_v16 = vld [vmem:[%s1370_s6 + $0x8] sm:$0xff] }
  0x4b   : > { %637 = vperm.xlu1 %953, %v629_v17  }
  0x4c   : > { %886 = vmatmul.mubr.msk.f32.gmra.mxu0 %vm378_vm0, %v353_v13 }
  0x4d   : > { %710 = vmatprep.mubr.f32.mxu0 %v1084_v0 }
  0xb5   : > { %v376_v22 = vpop.permute.xlu0 %375  ;;  %v366_v25 = vpop.permute.xlu1 %365 }
  0xb9   : > { %v371_v27 = vpop.permute.xlu0 %370 }
  0xba   : > { %v361_v33 = vpop.permute.xlu1 %360 }
  0xbd   : > { %v514_v55 = vpop.permute.xlu0 %513 }
  0xbe   : > { %v509_v57 = vpop.permute.xlu1 %508 }
  0xc1   : > { %v504_v63 = vpop.permute.xlu0 %503 }
  0xc2   : > { %v499_v3 = vpop.permute.xlu1 %498 }
  0xc5   : > { %v633_v17 = vpop.permute.xlu0 %632 }
 0x100   : > { %v457_v18 = vpop.f32.mrf.mxu0 }
 0x101   : > { %v458_v37 = vadd.f32 %v457_v18, %v361_v33 }
 0x102   : > { %v459_v19 = vpop.f32.mrf.mxu0 }
 0x103   : > { %v460_v36 = vadd.f32 %v459_v19, %v361_v33 }
 0x104   : > { %v463_v20 = vpop.f32.mrf.mxu0 }
 0x105   : > { %v464_v35 = vadd.f32 %v463_v20, %v366_v25  ;;  %v723_v20 = vld [vmem:[%s1235_s19] sm:$0xff] }
 0x106   : > { %v465_v21 = vpop.f32.mrf.mxu0 }
 0x107   : > { %v466_v34 = vadd.f32 %v465_v21, %v366_v25 }
 0x108   : > { %v469_v23 = vpop.f32.mrf.mxu0 }
 0x109   : > { %v470_v32 = vadd.f32 %v469_v23, %v371_v27  ;;  %v638_v23 = vpop.permute.xlu1 %637 }
 0x10a   : > { %v471_v24 = vpop.f32.mrf.mxu0 }
 0x10b   : > { %v472_v30 = vadd.f32 %v471_v24, %v371_v27  ;;  %v724_v24 = vld [vmem:[%s1235_s19 + $0x8] sm:$0xff] }
 0x10c   : > { %v475_v26 = vpop.f32.mrf.mxu0 }
 0x10d   : > { %v476_v28 = vadd.f32 %v475_v26, %v376_v22  ;;  %v725_v26 = vld [vmem:[%s1235_s19 + $0x10] sm:$0xff] }
 0x10e   : > { %v477_v29 = vpop.f32.mrf.mxu0 }
 0x10f   : > { %v478_v31 = vadd.f32 %v477_v29, %v376_v22  ;;  %v726_v29 = vld [vmem:[%s1235_s19 + $0x18] sm:$0xff]  ;;  %s880_s19 = sshll.u32 %s1231_s14, 1 }
 0x110   : > { %s339_s22 = scalar_lea.vmem [#allocation5], %s880_s19 }
 0x111   : > { %954 = vtanh.f32 %v478_v31  ;;  %s790_s23 = sshll.u32 %s339_s22, 4  ;;  %s791_s23 = int_to_ptr.vmem [resolvable:$true] %s790_s23 }
 0x112   : > { %956 = vtanh.f32 %v476_v28  ;;  %s1014_s25 = scalar_lea.vmem %s791_s23, 32  ;;  %p1021_p7 = scmp.lt.s32.totalorder %s791_s23, %s1019_s20 }
 0x113   : > { %958 = vtanh.f32 %v472_v30  ;;  %p1015_p11 = scmp.ne.s32.totalorder %s791_s23, %s1014_s25  ;;  %p1022_p8 = scmp.lt.s32.totalorder %s1020_s9, %s1014_s25 }
 0x114   : > { %960 = vtanh.f32 %v470_v32 }
 0x115   : > { %962 = vtanh.f32 %v466_v34  ;;  %p1016_p4 = pnand %p1015_p11, %p1383_p12  ;;  %p1023_p9 = por %p1022_p8, %p1021_p7 }
 0x116   : > { %964 = vtanh.f32 %v464_v35 }
 0x117   : > { %966 = vtanh.f32 %v460_v36  ;;  %p1017_p5 = pneg %p1016_p4 }
 0x118   : > { %968 = vtanh.f32 %v458_v37 }
 0x119   : > { %p1024_p0 = pnand %p1023_p9, %p1017_p5 }
 0x11e   : > { %v955_v38 = vpop.eup %954 }
 0x11f   : > { %v957_v39 = vpop.eup %956  ;;  %553 = vmatprep.subr.mxu1 %v955_v38 }
 0x120   : > { %v959_v40 = vpop.eup %958  ;;  %554 = vmatpush1.msra.mxu1 %v957_v39 }
 0x121   : > { %v961_v41 = vpop.eup %960  ;;  %555 = vmatprep.subr.mxu1 %v959_v40 }
 0x122   : > { %v963_v42 = vpop.eup %962  ;;  %556 = vmatpush1.msra.mxu1 %v961_v41 }
 0x123   : > { %v965_v43 = vpop.eup %964  ;;  %557 = vmatprep.subr.mxu1 %v963_v42 }
 0x124   : > { %v967_v44 = vpop.eup %966  ;;  %558 = vmatpush1.msra.mxu1 %v965_v43 }
 0x125   : > { %v969_v46 = vpop.eup %968  ;;  %559 = vmatprep.subr.mxu1 %v967_v44 }
 0x126   : > { %560 = vmatpush1.msra.mxu1 %v969_v46 }
 0x127   : > { %887 = vmatmul.mubr.msk.f32.vlgmr.msra.gmra.mxu1 %vm516_vm1, %v488_v45 }
 0x128   : > { %599 = vmatprep.mubr.f32.mxu1 %v1084_v0 }
 0x12b   : > { %888 = vmatmul.mubr.msk.f32.gmra.mxu1 %vm516_vm1, %v489_v47  ;;  %v1086_v47 = vmov 1966171168  }
 0x12c   : > { %605 = vmatprep.mubr.f32.mxu1 %v1084_v0 }
 0x12f   : > { %889 = vmatmul.mubr.msk.f32.gmra.mxu1 %vm516_vm1, %v490_v48  ;;  %v756_v48 = vunpack.c.l.s4 %v1086_v47 }
 0x130   : > { %611 = vmatprep.mubr.f32.mxu1 %v1084_v0 }
 0x133   : > { %890 = vmatmul.mubr.msk.f32.gmra.mxu1 %vm516_vm1, %v491_v49  ;;  %v758_v49 = vlaneseq }
 0x135   : > { %vm772_vm2 = vcmp.lt.s32.totalorder %v758_v49, 256 }
 0x1e7   : > { %v595_v50 = vpop.f32.mrf.mxu1 }
 0x1e8   : > { %v596_v6 = vadd.f32 %v595_v50, %v499_v3 }
 0x1e9   : > { %v597_v51 = vpop.f32.mrf.mxu1 }
 0x1ea   : > { %v598_v5 = vadd.f32 %v597_v51, %v499_v3 }
 0x1eb   : > { %v601_v52 = vpop.f32.mrf.mxu1 }
 0x1ec   : > { %v602_v4 = vadd.f32 %v601_v52, %v504_v63 }
 0x1ed   : > { %v603_v53 = vpop.f32.mrf.mxu1 }
 0x1ee   : > { %v604_v2 = vadd.f32 %v603_v53, %v504_v63 }
 0x1ef   : > { %v607_v54 = vpop.f32.mrf.mxu1 }
 0x1f0   : > { %v608_v1 = vadd.f32 %v607_v54, %v509_v57  ;;  %v757_v54 = vunpack.c.0.s8 %v756_v48 }
 0x1f1   : > { %v609_v56 = vpop.f32.mrf.mxu1 }
 0x1f2   : > { %v610_v61 = vadd.f32 %v609_v56, %v509_v57 }
 0x1f3   : > { %v613_v58 = vpop.f32.mrf.mxu1 }
 0x1f4   : > { %v614_v59 = vadd.f32 %v613_v58, %v514_v55 }
 0x1f5   : > { %v615_v60 = vpop.f32.mrf.mxu1 }
 0x1f6   : > { %v616_v62 = vadd.f32 %v615_v60, %v514_v55  ;;  %v759_v55 = vshrl.u32 %v758_v49, 7 }
 0x1f8   : > { %970 = vtanh.f32 %v616_v62 }
 0x1f9   : > { %972 = vtanh.f32 %v614_v59  ;;  %v760_v59 = vsub.s32 %v757_v54, %v759_v55 }
 0x1fa   : > { %974 = vtanh.f32 %v610_v61 }
 0x1fb   : > { %976 = vtanh.f32 %v608_v1 }
 0x1fc   : > { %978 = vtanh.f32 %v604_v2 }
 0x1fd   : > { %980 = vtanh.f32 %v602_v4 }
 0x1fe   : > { %982 = vtanh.f32 %v598_v5 }
 0x1ff   : > { %984 = vtanh.f32 %v596_v6 }
 0x205   : > { %v971_v7 = vpop.eup %970 }
 0x206   : > { %v973_v8 = vpop.eup %972  ;;  %670 = vmatprep.subr.mxu0 %v971_v7 }
 0x207   : > { %v975_v9 = vpop.eup %974  ;;  %671 = vmatpush1.msra.mxu0 %v973_v8 }
 0x208   : > { %v977_v10 = vpop.eup %976  ;;  %672 = vmatprep.subr.mxu0 %v975_v9 }
 0x209   : > { %v979_v11 = vpop.eup %978  ;;  %673 = vmatpush1.msra.mxu0 %v977_v10 }
 0x20a   : > { %v981_v12 = vpop.eup %980  ;;  %674 = vmatprep.subr.mxu0 %v979_v11 }
 0x20b   : > { %v983_v13 = vpop.eup %982  ;;  %675 = vmatpush1.msra.mxu0 %v981_v12 }
 0x20c   : > { %v985_v15 = vpop.eup %984  ;;  %676 = vmatprep.subr.mxu0 %v983_v13 }
 0x20d   : > { %677 = vmatpush1.msra.mxu0 %v985_v15 }
 0x20e   : > { %891 = vmatmul.mubr.msk.f32.vlgmr.msra.gmra.mxu0 %vm516_vm1, %v626_v14 }
 0x20f   : > { %716 = vmatprep.mubr.f32.mxu0 %v1084_v0 }
 0x212   : > { %892 = vmatmul.mubr.msk.f32.gmra.mxu0 %vm516_vm1, %v627_v16 }
 0x2ce   : > { %v712_v18 = vpop.f32.mrf.mxu0 }
 0x2cf   : > { %v713_v19 = vadd.f32 %v712_v18, %v633_v17 }
 0x2d0   : > { %v714_v21 = vpop.f32.mrf.mxu0 }
 0x2d1   : > { %v715_v22 = vadd.f32 %v714_v21, %v633_v17  ;;  %v727_v27 = vsub.f32 %v713_v19, %v723_v20 }
 0x2d2   : > { %v718_v25 = vpop.f32.mrf.mxu0 }
 0x2d3   : > { %v719_v28 = vadd.f32 %v718_v25, %v638_v23  ;;  %v728_v30 = vsub.f32 %v715_v22, %v724_v24  ;;  %v731_v33 = vmul.f32 %v727_v27, %v727_v27 }
 0x2d4   : > { %v720_v0 = vpop.f32.mrf.mxu0 }
 0x2d5   : > { %v729_v31 = vsub.f32 %v719_v28, %v725_v26  ;;  %v721_v32 = vadd.f32 %v720_v0, %v638_v23  ;;  %v732_v36 = vmul.f32 %v728_v30, %v728_v30 }
 0x2d7   : > { %v733_v34 = vmul.f32 %v729_v31, %v729_v31  ;;  %v730_v35 = vsub.f32 %v721_v32, %v726_v29 }
 0x2d9   : > { %v735_v37 = vadd.f32 %v733_v34, %v731_v33  ;;  %v734_v38 = vmul.f32 %v730_v35, %v730_v35 }
 0x2db   : > { %v736_v39 = vrot.slane %v735_v37, 4  ;;  %v742_v40 = vadd.f32 %v734_v38, %v732_v36 }
 0x2dd   : > { %v737_v41 = vadd.f32 %v736_v39, %v735_v37  ;;  %v743_v42 = vrot.slane %v742_v40, 4 }
 0x2df   : > { %v738_v43 = vrot.slane %v737_v41, 2  ;;  %v744_v44 = vadd.f32 %v743_v42, %v742_v40 }
 0x2e1   : > { %v739_v45 = vadd.f32 %v738_v43, %v737_v41  ;;  %v745_v46 = vrot.slane %v744_v44, 2 }
 0x2e3   : > { %v740_v50 = vrot.slane %v739_v45, 1  ;;  %v746_v51 = vadd.f32 %v745_v46, %v744_v44 }
 0x2e5   : > { %v741_v52 = vadd.f32 %v740_v50, %v739_v45  ;;  %v747_v53 = vrot.slane %v746_v51, 1 }
 0x2e7   : > { %v748_v56 = vadd.f32 %v747_v53, %v746_v51  ;;  %v750_v57 = vmul.f32 0.0625, %v741_v52 }
 0x2e9   : > { %v751_v58 = vmul.f32 0.0625, %v748_v56 }
 0x2eb   : > { %v754_v60 = vcombine.low %v750_v57, %v751_v58 }
 0x2ed   : > { %v761_v61 = vrot.slane %v754_v60, %v760_v59 }
 0x2ef   : > { %v768_v62 = vrot.slane %v761_v61, %v760_v59 }
 0x2f1   : > { %774 = vst.msk [vmem:[%s339_s22] sm:$0x3] %vm772_vm2, %v768_v62 }
 0x2f2   : > { %1027 = shalt.err (!%p1024_p0)
}
 0x2f3   : > { %s1028_s13 = scalar_lea.hbm %s788_s10, 32  ;;  %s1032_s19 = scalar_lea.hbm %s1372_s8, 128 }
 0x2f4   : > { %p1029_p2 = scmp.ne.s32.totalorder %s788_s10, %s1028_s13  ;;  %p1033_p3 = scmp.lt.s32.totalorder %s788_s10, %s1372_s8 }
 0x2f5   : > { %p1034_p6 = scmp.lt.s32.totalorder %s1032_s19, %s1028_s13 }
 0x2f6   : > { %p1030_p13 = pnand %p1029_p2, %p1383_p12 }
 0x2f7   : > { %p1035_p10 = por %p1034_p6, %p1033_p3 }
 0x2f8   : > { %p1031_p1 = pneg %p1030_p13 }
 0x2fa   : > { %p1036_p11 = pnand %p1035_p10, %p1031_p1 }
 0x2fc   : > { %1039 = shalt.err (!%p1036_p11)
}
 0x2fd   : > { %902 = dma.vmem_to_hbm [thread:$0]  (%p1383_p12), %s791_s23, 32, %s788_s10, %s776_s12  }
 0x2fe PF: > { %p913_p4 = scmp.ge.s32.totalorder %s1078_s30, 2  ;;  %s802_s24 = sand.u32 1, %s1066_s27  }
 0x2ff   : > { %p1384_p5 = scmp.ne.s32.totalorder %s1379_s18, 0  ;;  %s803_s26 = scalar_lea.sflag [#allocation4], %s802_s24 }
 0x301   : > { %p909_p7 = pnand %p913_p4, %p1384_p5 }
 0x303   : > { %p910_p8 = pneg %p909_p7 }
 0x305   : > { %1061 = dma.done.wait (%p910_p8), %s803_s26, 32  }
 0x306   : > { %1063 = vsyncadd (%p910_p8), %s803_s26, 4294967264  ;;  %s1385_s25 = sld [smem:[#allocation8_spill]]  ;;  %p21_p9 = scmp.ge.s32.totalorder %s1158_s11, 6  }
 0x307   : > { %s1386_s27 = smov %s1070_s28  ;;  %s1387_s28 = smov %s1074_s29 }
 0x308   : > { %s1389_s30 = smov %s1158_s11  ;;  %23 = sbr.rel (!%p21_p9) target bundleno = 5 (0x5), region = 100 }
 0x30c   : > { %s1388_s29 = smov %s1385_s25 }
 0x30d   :  { %808 = vsyncpa [#allocation3], 1 }
 0x30e   :  { %810 = vsyncpa [#allocation3 + $0x1], 1 }
 0x30f   :  { %811 = vsyncpa [#allocation4], 1 }
 0x310   :  { %813 = vsyncpa [#allocation4 + $0x1], 1 }

</bundles_post_ra>
